<compile_context>
chip_gen: v7x
topology: tpu7x:2x2x1
jax: 0.10.0
libtpu: 0.0.40
codegen_flags: <defaults>
</compile_context>

<pallas_src>
import jax
import jax.numpy as jnp
from jax.experimental import pallas as pl
from jax.experimental.pallas import tpu as pltpu


def se_kernel(x_ref, q_ref, qt_ref, w1b_ref, b1_ref, w2b_ref, b2c_ref, o_ref):
    # x_ref:  (Nb*C, HW)        -- batch-chunk of activations, rows = (n, c)
    # q_ref:  (Nb, Nb*C)        -- segment-sum indicator (gather rows -> batch)
    # qt_ref: (Nb*C, Nb)        -- scatter indicator (batch -> rows)
    # w1b_ref:(Nb*C, S)         -- FC1 weight, 1/HW folded in, tiled per row
    # b1_ref: (1, S)
    # w2b_ref:(Nb*C, S)         -- FC2 weight, tiled per row
    # b2c_ref:(Nb*C, 1)
    # o_ref:  (Nb*C, HW)
    x = x_ref[...]                                                  # (NbC, HW)

    # --- squeeze: spatial sum per (n, c) row, f32 accumulation -------------
    s_col = jnp.sum(x.astype(jnp.float32), axis=-1, keepdims=True)  # (NbC, 1)

    # --- FC1 (+ bias), mean's 1/HW already folded into w1b -----------------
    # h[n, j] = sum_c s[n, c] * w1[j, c] / HW  + b1[j]
    h = jnp.dot(q_ref[...], s_col * w1b_ref[...],
                preferred_element_type=jnp.float32) + b1_ref[...]   # (Nb, S)
    h = h * jax.nn.sigmoid(h)                                       # Swish

    # --- FC2 (+ bias) fused with the scatter back to per-row gates ---------
    hr = jnp.dot(qt_ref[...], h, preferred_element_type=jnp.float32)  # (NbC, S)
    g = jax.nn.sigmoid(
        jnp.sum(hr * w2b_ref[...], axis=-1, keepdims=True)
        + b2c_ref[...])                                             # (NbC, 1)

    # --- scale: per-(n, c) gate broadcast over the spatial lanes -----------
    o_ref[...] = (x * g.astype(x.dtype)).astype(o_ref.dtype)


def _pick_batch_chunk(n, c, hw, itemsize, budget_bytes):
    """Largest divisor of n whose (nb*c, hw) block stays under the budget."""
    best = 1
    for nb in range(1, n + 1):
        if n % nb == 0 and nb * c * hw * itemsize <= budget_bytes:
            best = nb
    return best


def se_forward(x, w1, b1, w2, b2, *, block_budget_bytes=8 << 20):
    """x: (N, C, H, W); w1: (S, C), b1: (S,), w2: (C, S), b2: (C,)."""
    N, C, H, W = x.shape
    S = w1.shape[0]
    HW = H * W
    itemsize = x.dtype.itemsize

    x2 = x.reshape(N * C, HW)                      # free reshape of NCHW

    nb = _pick_batch_chunk(N, C, HW, itemsize, block_budget_bytes)
    brows = nb * C                                 # rows per block

    f32 = jnp.float32
    # Indicator matrices for the (nb*C,) <-> (nb, C) regrouping (tiny).
    row_batch = jnp.arange(brows) // C
    q = (jnp.arange(nb)[:, None] == row_batch[None, :]).astype(f32)   # (nb, nb*C)
    qt = (row_batch[:, None] == jnp.arange(nb)[None, :]).astype(f32)  # (nb*C, nb)

    # 1x1 convs as dense mats; fold the mean's 1/HW into FC1; tile per row.
    w1big = jnp.tile(w1.astype(f32).T / HW, (nb, 1))   # (nb*C, S)
    w2big = jnp.tile(w2.astype(f32), (nb, 1))          # (nb*C, S)
    b1r = b1.astype(f32).reshape(1, S)
    b2c = jnp.tile(b2.astype(f32).reshape(C, 1), (nb, 1))   # (nb*C, 1)

    cost = pl.CostEstimate(
        flops=N * C * HW + 4 * N * C * S,
        transcendentals=N * (S + C),
        bytes_accessed=2 * N * C * HW * itemsize,
    )

    out = pl.pallas_call(
        se_kernel,
        out_shape=jax.ShapeDtypeStruct((N * C, HW), x.dtype),
        grid_spec=pltpu.PrefetchScalarGridSpec(
            num_scalar_prefetch=0,
            grid=(N // nb,),
            in_specs=[
                pl.BlockSpec((brows, HW), lambda i: (i, 0)),   # x chunk
                pl.BlockSpec((nb, brows), lambda i: (0, 0)),   # q
                pl.BlockSpec((brows, nb), lambda i: (0, 0)),   # qt
                pl.BlockSpec((brows, S), lambda i: (0, 0)),    # w1big
                pl.BlockSpec((1, S), lambda i: (0, 0)),        # b1
                pl.BlockSpec((brows, S), lambda i: (0, 0)),    # w2big
                pl.BlockSpec((brows, 1), lambda i: (0, 0)),    # b2col
            ],
            out_specs=pl.BlockSpec((brows, HW), lambda i: (i, 0)),
        ),
        compiler_params=pltpu.CompilerParams(
            dimension_semantics=("parallel",),
            vmem_limit_bytes=48 << 20,
        ),
        cost_estimate=cost,
    )(x2, q, qt, w1big, b1r, w2big, b2c)

    return out.reshape(N, C, H, W)


def se_reference(x, w1, b1, w2, b2):
    """Plain-JAX reference mirroring the PyTorch SE forward."""
    s = jnp.mean(x, axis=(2, 3))                         # (N, C)
    h = s @ w1.T + b1                                    # (N, S)
    h = h * jax.nn.sigmoid(h)                            # swish
    g = jax.nn.sigmoid(h @ w2.T + b2)                    # (N, C)
    return x * g[:, :, None, None]


if __name__ == "__main__":
    # Small shapes consistent with SE(w_in=4, w_se=8) on a 2x4x16x16 input.
    N, C, H, W = 2, 4, 16, 16
    w_se = 8

    key = jax.random.PRNGKey(0)
    kx, k1, k2, k3, k4 = jax.random.split(key, 5)

    x = jax.random.normal(kx, (N, C, H, W), dtype=jnp.float32)
    # Conv2d 1x1 == dense over channels.
    w1 = 0.1 * jax.random.normal(k1, (w_se, C), dtype=jnp.float32)   # conv1 weight
    b1 = 0.1 * jax.random.normal(k2, (w_se,), dtype=jnp.float32)     # conv1 bias
    w2 = 0.1 * jax.random.normal(k3, (C, w_se), dtype=jnp.float32)   # conv2 weight
    b2 = 0.1 * jax.random.normal(k4, (C,), dtype=jnp.float32)        # conv2 bias

    out = se_forward(x, w1, b1, w2, b2)
    jax.block_until_ready(out)

    ref = se_reference(x, w1, b1, w2, b2)
    assert out.shape == (N, C, H, W)
    assert jnp.allclose(out, ref, atol=1e-5, rtol=1e-5), "mismatch vs reference"

    print("KERNEL_OK")
</pallas_src>

<mosaic_0001>
module attributes {stable_mosaic.version = 11 : i64} {
  func.func @se_kernel(%arg0: i32, %arg1: memref<8x256xf32, #tpu.memory_space<vmem>>, %arg2: memref<2x8xf32, #tpu.memory_space<vmem>>, %arg3: memref<8x2xf32, #tpu.memory_space<vmem>>, %arg4: memref<8x8xf32, #tpu.memory_space<vmem>>, %arg5: memref<1x8xf32, #tpu.memory_space<vmem>>, %arg6: memref<8x8xf32, #tpu.memory_space<vmem>>, %arg7: memref<8x1xf32, #tpu.memory_space<vmem>>, %arg8: memref<8x256xf32, #tpu.memory_space<vmem>>) attributes {dimension_semantics = [#tpu.dimension_semantics<parallel>], iteration_bounds = array<i64: 1>, scalar_prefetch = 0 : i64, scratch_operands = 0 : i64, tpu.core_type = #tpu.core_type<tc>, window_params = [{transform_indices = @transform_0, window_bounds = array<i64: 8, 256>}, {pipeline_mode = #tpu.pipeline_mode<synchronous>, transform_indices = @transform_1, window_bounds = array<i64: 2, 8>}, {pipeline_mode = #tpu.pipeline_mode<synchronous>, transform_indices = @transform_2, window_bounds = array<i64: 8, 2>}, {pipeline_mode = #tpu.pipeline_mode<synchronous>, transform_indices = @transform_3, window_bounds = array<i64: 8, 8>}, {pipeline_mode = #tpu.pipeline_mode<synchronous>, transform_indices = @transform_4, window_bounds = array<i64: 1, 8>}, {pipeline_mode = #tpu.pipeline_mode<synchronous>, transform_indices = @transform_5, window_bounds = array<i64: 8, 8>}, {pipeline_mode = #tpu.pipeline_mode<synchronous>, transform_indices = @transform_6, window_bounds = array<i64: 8, 1>}, {transform_indices = @transform_7, window_bounds = array<i64: 8, 256>}]} {
    %c0 = arith.constant 0 : index
    %c0_0 = arith.constant 0 : index
    %0 = vector.load %arg1[%c0, %c0_0] : memref<8x256xf32, #tpu.memory_space<vmem>>, vector<8x256xf32>
    %cst = arith.constant dense<0.000000e+00> : vector<8xf32>
    %1 = vector.multi_reduction <add>, %0, %cst [1] : vector<8x256xf32> to vector<8xf32>
    %2 = vector.shape_cast %1 : vector<8xf32> to vector<8x1xf32>
    %c0_1 = arith.constant 0 : index
    %c0_2 = arith.constant 0 : index
    %3 = vector.load %arg2[%c0_1, %c0_2] : memref<2x8xf32, #tpu.memory_space<vmem>>, vector<2x8xf32>
    %c0_3 = arith.constant 0 : index
    %c0_4 = arith.constant 0 : index
    %4 = vector.load %arg4[%c0_3, %c0_4] : memref<8x8xf32, #tpu.memory_space<vmem>>, vector<8x8xf32>
    %5 = vector.broadcast %2 : vector<8x1xf32> to vector<8x8xf32>
    %6 = arith.mulf %5, %4 : vector<8x8xf32>
    %cst_5 = arith.constant dense<0.000000e+00> : vector<2x8xf32>
    %7 = tpu.matmul %3, %6, %cst_5 {dimension_numbers = #tpu.dot_dimension_numbers<[1], [0], [0], [1], [0, 0, 1, 1], [], []>} : vector<2x8xf32>, vector<8x8xf32>, vector<2x8xf32> -> vector<2x8xf32>
    %c0_6 = arith.constant 0 : index
    %c0_7 = arith.constant 0 : index
    %8 = vector.load %arg5[%c0_6, %c0_7] : memref<1x8xf32, #tpu.memory_space<vmem>>, vector<1x8xf32>
    %9 = vector.broadcast %8 : vector<1x8xf32> to vector<2x8xf32>
    %10 = arith.addf %7, %9 : vector<2x8xf32>
    %11 = arith.negf %10 : vector<2x8xf32>
    %12 = math.exp %11 : vector<2x8xf32>
    %cst_8 = arith.constant 1.000000e+00 : f32
    %13 = vector.broadcast %cst_8 : f32 to vector<2x8xf32>
    %14 = arith.addf %13, %12 : vector<2x8xf32>
    %15 = arith.divf %13, %14 : vector<2x8xf32>
    %16 = arith.mulf %10, %15 : vector<2x8xf32>
    %c0_9 = arith.constant 0 : index
    %c0_10 = arith.constant 0 : index
    %17 = vector.load %arg3[%c0_9, %c0_10] : memref<8x2xf32, #tpu.memory_space<vmem>>, vector<8x2xf32>
    %cst_11 = arith.constant dense<0.000000e+00> : vector<8x8xf32>
    %18 = tpu.matmul %17, %16, %cst_11 {dimension_numbers = #tpu.dot_dimension_numbers<[1], [0], [0], [1], [0, 0, 1, 1], [], []>} : vector<8x2xf32>, vector<2x8xf32>, vector<8x8xf32> -> vector<8x8xf32>
    %c0_12 = arith.constant 0 : index
    %c0_13 = arith.constant 0 : index
    %19 = vector.load %arg6[%c0_12, %c0_13] : memref<8x8xf32, #tpu.memory_space<vmem>>, vector<8x8xf32>
    %20 = arith.mulf %18, %19 : vector<8x8xf32>
    %cst_14 = arith.constant dense<0.000000e+00> : vector<8xf32>
    %21 = vector.multi_reduction <add>, %20, %cst_14 [1] : vector<8x8xf32> to vector<8xf32>
    %22 = vector.shape_cast %21 : vector<8xf32> to vector<8x1xf32>
    %c0_15 = arith.constant 0 : index
    %c0_16 = arith.constant 0 : index
    %23 = vector.load %arg7[%c0_15, %c0_16] : memref<8x1xf32, #tpu.memory_space<vmem>>, vector<8x1xf32>
    %24 = arith.addf %22, %23 : vector<8x1xf32>
    %25 = arith.negf %24 : vector<8x1xf32>
    %26 = math.exp %25 : vector<8x1xf32>
    %cst_17 = arith.constant 1.000000e+00 : f32
    %27 = vector.broadcast %cst_17 : f32 to vector<8x1xf32>
    %28 = arith.addf %27, %26 : vector<8x1xf32>
    %29 = arith.divf %27, %28 : vector<8x1xf32>
    %30 = vector.broadcast %29 : vector<8x1xf32> to vector<8x256xf32>
    %31 = arith.mulf %0, %30 : vector<8x256xf32>
    %c0_18 = arith.constant 0 : index
    %c0_19 = arith.constant 0 : index
    %32 = vector.load %arg8[%c0_18, %c0_19] : memref<8x256xf32, #tpu.memory_space<vmem>>, vector<8x256xf32>
    tpu.vector_store %arg8[%c0_18, %c0_19], %31 {strides = array<i32>} : memref<8x256xf32, #tpu.memory_space<vmem>>, vector<8x256xf32>,
    return
  }
  func.func @transform_0(%arg0: i32) -> (i32, i32) {
    %c0_i32 = arith.constant 0 : i32
    %c0_i32_0 = arith.constant 0 : i32
    return %arg0, %c0_i32 : i32, i32
  }
  func.func @transform_1(%arg0: i32) -> (i32, i32) {
    %c0_i32 = arith.constant 0 : i32
    %c0_i32_0 = arith.constant 0 : i32
    %c0_i32_1 = arith.constant 0 : i32
    return %c0_i32, %c0_i32_0 : i32, i32
  }
  func.func @transform_2(%arg0: i32) -> (i32, i32) {
    %c0_i32 = arith.constant 0 : i32
    %c0_i32_0 = arith.constant 0 : i32
    %c0_i32_1 = arith.constant 0 : i32
    return %c0_i32, %c0_i32_0 : i32, i32
  }
  func.func @transform_3(%arg0: i32) -> (i32, i32) {
    %c0_i32 = arith.constant 0 : i32
    %c0_i32_0 = arith.constant 0 : i32
    %c0_i32_1 = arith.constant 0 : i32
    return %c0_i32, %c0_i32_0 : i32, i32
  }
  func.func @transform_4(%arg0: i32) -> (i32, i32) {
    %c0_i32 = arith.constant 0 : i32
    %c0_i32_0 = arith.constant 0 : i32
    %c0_i32_1 = arith.constant 0 : i32
    return %c0_i32, %c0_i32_0 : i32, i32
  }
  func.func @transform_5(%arg0: i32) -> (i32, i32) {
    %c0_i32 = arith.constant 0 : i32
    %c0_i32_0 = arith.constant 0 : i32
    %c0_i32_1 = arith.constant 0 : i32
    return %c0_i32, %c0_i32_0 : i32, i32
  }
  func.func @transform_6(%arg0: i32) -> (i32, i32) {
    %c0_i32 = arith.constant 0 : i32
    %c0_i32_0 = arith.constant 0 : i32
    %c0_i32_1 = arith.constant 0 : i32
    return %c0_i32, %c0_i32_0 : i32, i32
  }
  func.func @transform_7(%arg0: i32) -> (i32, i32) {
    %c0_i32 = arith.constant 0 : i32
    %c0_i32_0 = arith.constant 0 : i32
    return %arg0, %c0_i32 : i32, i32
  }
}

</mosaic_0001>

<bundles_post_ra>
// kernel: tpu_custom_call.1
= control target key start
LH: loop header
LB: loop body
LE: loop exit
PB: predicated region body
PF: predicated region fallthrough
CT: control target
= control target key end

     0   :  { %12 = vsyncpa [#allocation3], 0  ;;  %s426_s0 = inlined_call_operand.vmem [shape: f32[8,256], index: 0, kind: input, shape index: {}]   ;;  %s427_s1 = inlined_call_operand.vmem [shape: f32[2,8], index: 1, kind: input, shape index: {}]   ;;  %s428_s2 = inlined_call_operand.vmem [shape: f32[8,2], index: 2, kind: input, shape index: {}]   ;;  %s429_s3 = inlined_call_operand.vmem [shape: f32[8,8], index: 3, kind: input, shape index: {}]   ;;  %s430_s4 = inlined_call_operand.hbm [shape: f32[1,8], index: 4, kind: input, shape index: {}]   ;;  %s431_s5 = inlined_call_operand.vmem [shape: f32[8,8], index: 5, kind: input, shape index: {}]   ;;  %s432_s6 = inlined_call_operand.vmem [shape: f32[8,1], index: 6, kind: input, shape index: {}]   ;;  %s433_s7 = inlined_call_operand.hbm [shape: f32[8,256], index: 7, kind: output, shape index: {}]  }
   0x1   :  { %13 = vsyncpa [#allocation4], 0  ;;  %s334_s24 = smov [#allocation2]   ;;  %s286_s28 = scalar_lea.hbm %s430_s4, 16 }
   0x2   :  { %s28_s25 = sshll.u32 %s334_s24, 4  ;;  %p287_p0 = scmp.ne.s32.totalorder %s430_s4, %s286_s28  ;;  %s29_s25 = int_to_ptr.vmem [resolvable:$true] %s28_s25 }
   0x3   :  { %p290_p1 = scmp.lt.u32.totalorder %s286_s28, %s430_s4 }
   0x5   :  { %p292_p2 = pnand %p290_p1, %p287_p0 }
   0x7   :  { %295 = shalt.err (!%p292_p2)
}
   0x8   :  { %s296_s10 = scalar_lea.vmem %s29_s25, 16  ;;  %s300_s11 = scalar_lea.vmem %s29_s25, 32 }
   0x9   :  { %p297_p3 = scmp.ne.s32.totalorder %s29_s25, %s296_s10  ;;  %p301_p4 = scmp.lt.s32.totalorder %s29_s25, %s29_s25 }
   0xa   :  { %p302_p5 = scmp.lt.s32.totalorder %s300_s11, %s296_s10 }
   0xc   :  { %p303_p6 = por %p302_p5, %p301_p4 }
   0xe   :  { %p304_p7 = pnand %p303_p6, %p297_p3 }
  0x10   :  { %307 = shalt.err (!%p304_p7)
}
  0x11   :  { %31 = dma.hbm_to_vmem [thread:$0]  %s430_s4, 16, %s29_s25, [#allocation3]  }
  0x12   :  { %330 = dma.done.wait [#allocation3], 16  }
  0x13   :  { %331 = vsyncadd [#allocation3], 4294967280  ;;  %v39_v0 = vld [vmem:[%s426_s0] sm:$0xff]  ;;  %v40_v1 = vld [vmem:[%s426_s0 + $0x8] sm:$0xff]  ;;  %v335_v3 = vmov 0.0   ;;  %vm336_vm0 = vmmov 0  }
  0x14   :  { %v41_v2 = vadd.f32 %v40_v1, %v39_v0  ;;  %261 = vmatprep.subr.mxu0 %v335_v3  ;;  %266 = vmatprep.subr.mxu1 %v335_v3  ;;  %v45_v4 = vld [vmem:[%s429_s3] sm:$0xff]  ;;  %vm54_vm1 = vcmask 64512   ;;  %vm140_vm2 = vcmask 1041408   ;;  %vm136_vm3 = vcmask 15360  }
  0x15   :  { %263 = vmatprep.mubr.msk.f32.mxu0 %vm336_vm0, %v335_v3  ;;  %268 = vmatprep.mubr.msk.f32.mxu1 %vm336_vm0, %v335_v3  ;;  %v44_v7 = vld [vmem:[%s427_s1] sm:$0x3]  ;;  %v337_v23 = vmov 0  }
  0x16   :  { %42 = vadd.xlane.f32.xlu0 %v41_v2  ;;  %v251_v8 = vld [vmem:[#allocation2] ss:$0 sm:$0xff]  ;;  %276 = vset.pattern.permute.xlu1 %v337_v23 }
  0x17   :  { %v135_v17 = vld [vmem:[%s428_s2] sm:$0xff]  ;;  %277 = vset.pattern.permute.xlu0 %v337_v23  ;;  %s338_s2 = smov [#allocation5]  }
  0x18   :  { %v214_v18 = vld [vmem:[%s431_s5] sm:$0xff]  ;;  %s242_s5 = sshll.u32 %s338_s2, 4  ;;  %s243_s5 = int_to_ptr.vmem [resolvable:$true] %s242_s5 }
  0x19   :  { %v219_v24 = vld [vmem:[%s432_s6] sm:$0xff]  ;;  %s308_s24 = scalar_lea.vmem %s243_s5, 256  ;;  %p313_p9 = scmp.lt.s32.totalorder %s243_s5, %s243_s5 }
  0x1a   :  { %p309_p8 = scmp.ne.s32.totalorder %s243_s5, %s308_s24  ;;  %p314_p10 = scmp.lt.s32.totalorder %s308_s24, %s308_s24 }
  0x1c   :  { %p315_p11 = por %p314_p10, %p313_p9 }
  0x1e   :  { %p316_p12 = pnand %p315_p11, %p309_p8 }
  0xa3   :  { %v43_v5 = vpop.xlane.xlu0 %42 }
  0xa4   :  { %v46_v6 = vmul.f32 %v45_v4, %v43_v5 }
  0xa6   :  { %262 = vmatpush3.msra.mxu0 %v46_v6 }
  0xa7   :  { %264 = vmatmul.mubr.msk.f32.vlgmr.msra.gmra.mrb[0].mxu0 %vm54_vm1, %v44_v7 }
 0x17a   :  { %v124_v9 = vpop.f32.mrb[0].mxu0 }
 0x17b   :  { %v125_v10 = vadd.f32 %v251_v8, %v124_v9  ;;  %v265_v11 = vpop.f32.mrb[1].mxu0 }
 0x17d   :  { %v253_v12 = vmul.f32 -1.442695, %v125_v10 }
 0x17f   :  { %278 = vpow2.f32 %v253_v12 }
 0x189   :  { %v279_v13 = vpop.eup %278 }
 0x18a   :  { %v131_v14 = vadd.f32 1.0, %v279_v13 }
 0x18c   :  { %280 = vrcp.f32 %v131_v14 }
 0x196   :  { %v281_v15 = vpop.eup %280 }
 0x197   :  { %v134_v16 = vmul.f32 %v281_v15, %v125_v10 }
 0x199   :  { %267 = vmatpush3.msk.msra.mxu1 %vm140_vm2, %v134_v16 }
 0x19a   :  { %269 = vmatmul.mubr.msk.f32.vlgmr.msra.gmra.mrb[0].mxu1 %vm136_vm3, %v135_v17 }
 0x26d   :  { %v210_v19 = vpop.f32.mrb[0].mxu1 }
 0x26e   :  { %v215_v20 = vmul.f32 %v214_v18, %v210_v19  ;;  %v270_v21 = vpop.f32.mrb[1].mxu1 }
 0x270   :  { %v216_v22 = vsel %vm54_vm1, %v215_v20, 0.0 }
 0x271   :  { %217 = vadd.xlane.f32.xlu0 %v216_v22 }
 0x2fe   :  { %v218_v25 = vpop.xlane.xlu0 %217 }
 0x2ff   :  { %v220_v26 = vadd.f32 %v219_v24, %v218_v25 }
 0x301   :  { %v256_v27 = vmul.f32 -1.442695, %v220_v26 }
 0x303   :  { %282 = vpow2.f32 %v256_v27 }
 0x30d   :  { %v283_v28 = vpop.eup %282 }
 0x30e   :  { %v224_v29 = vadd.f32 1.0, %v283_v28 }
 0x310   :  { %284 = vrcp.f32 %v224_v29 }
 0x31a   :  { %v285_v30 = vpop.eup %284 }
 0x31b   :  { %229 = vperm.xlu1 %276, %v285_v30  }
 0x39a   :  { %v230_v31 = vpop.permute.xlu1 %229 }
 0x39b   :  { %v232_v32 = vmul.f32 %v230_v31, %v39_v0  ;;  %v233_v33 = vmul.f32 %v230_v31, %v40_v1 }
 0x39d   :  { %234 = vst [vmem:[#allocation5] sm:$0xff] %v232_v32  ;;  %235 = vst [vmem:[#allocation5 + $0x8] sm:$0xff] %v233_v33 }
 0x39e   :  { %319 = shalt.err (!%p316_p12)
}
 0x39f   :  { %s320_s26 = scalar_lea.hbm %s433_s7, 256 }
 0x3a0   :  { %p321_p13 = scmp.ne.s32.totalorder %s433_s7, %s320_s26  ;;  %p324_p0 = scmp.lt.u32.totalorder %s320_s26, %s433_s7 }
 0x3a2   :  { %p326_p1 = pnand %p324_p0, %p321_p13 }
 0x3a4   :  { %329 = shalt.err (!%p326_p1)
}
 0x3a5   :  { %245 = dma.vmem_to_hbm [thread:$0]  %s243_s5, 256, %s433_s7, [#allocation4]  }
 0x3a6   :  { %332 = dma.done.wait [#allocation4], 256  }
 0x3a7   :  { %333 = vsyncadd [#allocation4], 4294967040 }
 0x3a8   :  { %249 = vsyncpa [#allocation3], 1 }
 0x3a9   :  { %250 = vsyncpa [#allocation4], 1 }

</bundles_post_ra>
